<compile_context>
chip_gen: v7x
topology: tpu7x:2x2x1
jax: 0.10.0
libtpu: 0.0.40
codegen_flags: <defaults>
</compile_context>

<pallas_src>
import functools
import math

import numpy as np
import jax
import jax.numpy as jnp
from jax import lax
from jax.experimental import pallas as pl
from jax.experimental.pallas import tpu as pltpu


# --------------------------- fused decoder kernel ---------------------------


def _decoder_kernel(x_ref, pe_ref,
                    ln1_g_ref, ln1_b_ref, wqkv_ref, wo_ref,
                    ln2_g_ref, ln2_b_ref, w1_ref, b1_ref, w2_ref, b2_ref,
                    wlog_ref, o_ref, x_sc, heads_sc, *, n_head, d_head):
    """One grid step = one (batch b, layer l) pair.

    x_ref    : (1, S, D)  token embeddings for batch b (f32)
    pe_ref   : (S, D)     fixed sinusoidal PE (f32, shared across batch)
    *_ref    : per-layer weights, leading n_layers axis blocked to 1 (bf16
               matmul weights, f32 LN params / biases)
    wlog_ref : (D, Vp)    logits head, lane-padded to Vp (multiple of 128), bf16
    o_ref    : (1, S, Vp) padded logits for batch b (written on last layer)
    x_sc     : (S, D) f32 VMEM scratch; activation resident across layers
    heads_sc : (S, HD) f32 VMEM scratch; per-head attention outputs
    """
    l = pl.program_id(1)
    n_layers = pl.num_programs(1)
    HD = n_head * d_head
    eps = 1e-5
    bf16 = jnp.bfloat16

    # ---- layer 0: token emb + positional emb into the resident activation ----
    @pl.when(l == 0)
    def _():
        x_sc[...] = x_ref[0] + pe_ref[...]

    S = x_sc.shape[0]
    # Causal mask generated in-kernel (cheap VPU iota/compare; no HBM bias).
    rows = lax.broadcasted_iota(jnp.int32, (S, S), 0)
    cols = lax.broadcasted_iota(jnp.int32, (S, S), 1)
    causal = cols <= rows

    def _layer_norm(h, g, b):
        mu = jnp.mean(h, axis=-1, keepdims=True)
        var = jnp.mean((h - mu) ** 2, axis=-1, keepdims=True)
        return (h - mu) * lax.rsqrt(var + eps) * g + b

    x = x_sc[...]                                                  # (S, D) f32

    # ---- pre-norm 1 + fused QKV projection (single bf16 MXU matmul) ----
    xn = _layer_norm(x, ln1_g_ref[0], ln1_b_ref[0]).astype(bf16)
    qkv = jnp.dot(xn, wqkv_ref[0],
                  preferred_element_type=jnp.float32)              # (S, 3*HD)

    # ---- causal MHA: heads statically unrolled; per-head outputs are
    #      collected into heads_sc, then ONE (S,HD)x(HD,D) out-projection ----
    # TODO(synk): at real sizes keep d_head a multiple of 128 (or pad) so these
    # lane slices are 128-aligned; at d_head=16 they are lane-underfilled.
    for h in range(n_head):
        q_h = qkv[:, h * d_head:(h + 1) * d_head]        # scale folded at init
        k_h = qkv[:, HD + h * d_head:HD + (h + 1) * d_head]
        v_h = qkv[:, 2 * HD + h * d_head:2 * HD + (h + 1) * d_head]
        s = lax.dot_general(q_h.astype(bf16), k_h.astype(bf16),
                            (((1,), (1,)), ((), ())),
                            preferred_element_type=jnp.float32)    # (S, S)
        s = jnp.where(causal, s, jnp.float32(-1e30))
        m = jnp.max(s, axis=-1, keepdims=True)
        p = jnp.exp(s - m)
        inv = pl.reciprocal(jnp.sum(p, axis=-1, keepdims=True), approx=True)
        p = p * inv
        o_h = jnp.dot(p.astype(bf16), v_h.astype(bf16),
                      preferred_element_type=jnp.float32)          # (S, d_head)
        heads_sc[:, h * d_head:(h + 1) * d_head] = o_h

    attn = jnp.dot(heads_sc[...].astype(bf16), wo_ref[0],
                   preferred_element_type=jnp.float32)             # (S, D)
    h1 = x + attn

    # ---- pre-norm 2 + GELU FFN ----
    hn = _layer_norm(h1, ln2_g_ref[0], ln2_b_ref[0]).astype(bf16)
    ff = jnp.dot(hn, w1_ref[0], preferred_element_type=jnp.float32) + b1_ref[0]
    # TODO(synk): torch nn.GELU defaults to exact erf; tanh approx used here.
    ff = jax.nn.gelu(ff, approximate=True)
    ff = jnp.dot(ff.astype(bf16), w2_ref[0],
                 preferred_element_type=jnp.float32) + b2_ref[0]

    x_sc[...] = h1 + ff

    # ---- last layer: lane-dense logits head (Vp multiple of 128) ----
    # TODO(synk): for realistic vocab sizes tile the (D, Vp) matmul over a
    # vocab grid axis (and set vmem_limit_bytes) instead of one resident block.
    @pl.when(l == n_layers - 1)
    def _():
        o_ref[0] = jnp.dot(x_sc[...].astype(bf16), wlog_ref[...],
                           preferred_element_type=jnp.float32)


# ----------------------------- host-side helpers -----------------------------


def _fixed_sinusoidal_pe(seq_len, dim, dtype=jnp.float32):
    # PositionalEncodingType.FIXED: sin/cos table, concat([sin, cos], dim=-1).
    # TODO(synk): verify concat-vs-interleave layout against the PE factory.
    half = dim // 2
    inv_freq = 1.0 / (10000.0 ** (np.arange(half, dtype=np.float32) / half))
    pos = np.arange(seq_len, dtype=np.float32)
    ang = pos[:, None] * inv_freq[None, :]
    tbl = np.concatenate([np.sin(ang), np.cos(ang)], axis=-1)
    return jnp.asarray(tbl, dtype=dtype)


def init_params(key, *, num_tokens, max_seq_len, dim, n_layers, n_head, d_head,
                ffn_mul):
    HD = n_head * d_head
    F = dim * ffn_mul
    v_pad = pl.cdiv(num_tokens, 128) * 128             # lane-dense logits head
    ks = jax.random.split(key, 6)
    bf16 = jnp.bfloat16

    def norm(k, shape, scale=0.02):
        return (scale * jax.random.normal(k, shape)).astype(jnp.float32)

    w_logits = norm(ks[1], (dim, num_tokens))           # Linear(dim, V, bias=False)
    w_logits_padded = (jnp.zeros((dim, v_pad), jnp.float32)
                       .at[:, :num_tokens].set(w_logits))

    wqkv = norm(ks[2], (n_layers, dim, 3 * HD))
    # Fold the 1/sqrt(d_head) attention scale into the Q projection (zero cost).
    wqkv = wqkv.at[:, :, :HD].multiply(1.0 / math.sqrt(d_head))

    stacked = {
        "ln1_g": jnp.ones((n_layers, 1, dim), jnp.float32),
        "ln1_b": jnp.zeros((n_layers, 1, dim), jnp.float32),
        "wqkv": wqkv.astype(bf16),
        "wo": norm(ks[3], (n_layers, HD, dim)).astype(bf16),
        "ln2_g": jnp.ones((n_layers, 1, dim), jnp.float32),
        "ln2_b": jnp.zeros((n_layers, 1, dim), jnp.float32),
        "w1": norm(ks[4], (n_layers, dim, F)).astype(bf16),
        "b1": jnp.zeros((n_layers, 1, F), jnp.float32),
        "w2": norm(ks[5], (n_layers, F, dim)).astype(bf16),
        "b2": jnp.zeros((n_layers, 1, dim), jnp.float32),
    }
    return {
        "token_emb": norm(ks[0], (num_tokens, dim)),
        "w_logits": w_logits_padded.astype(bf16),
        "pe_table": _fixed_sinusoidal_pe(max_seq_len, dim),   # built once
        "stacked": stacked,
    }


def forward(tokens, params, *, n_head, d_head, num_tokens):
    B, S = tokens.shape
    pe_table = params["pe_table"]
    max_seq_len = pe_table.shape[0]
    if S > max_seq_len:                    # keep only the last max_seq_len tokens
        tokens = tokens[:, -max_seq_len:]
        S = max_seq_len
    D = params["token_emb"].shape[1]
    st = params["stacked"]
    L = st["wqkv"].shape[0]
    HD = n_head * d_head
    F = st["w1"].shape[-1]
    Vp = params["w_logits"].shape[1]

    # Embedding gather kept as plain-JAX glue (data-dependent rows).
    # TODO(synk): could be fused via PrefetchScalarGridSpec + pl.Element gather.
    x = jnp.take(params["token_emb"], tokens.reshape(-1), axis=0).reshape(B, S, D)
    pe = pe_table[:S]                                              # (S, D)

    kernel = functools.partial(_decoder_kernel, n_head=n_head, d_head=d_head)

    grid_spec = pltpu.PrefetchScalarGridSpec(
        num_scalar_prefetch=0,
        grid=(B, L),          # batch: parallel (v7x 2 TCs); layers: arbitrary
        in_specs=[
            pl.BlockSpec((1, S, D), lambda b, l: (b, 0, 0)),        # x
            pl.BlockSpec((S, D), lambda b, l: (0, 0)),              # pe
            pl.BlockSpec((1, 1, D), lambda b, l: (l, 0, 0)),        # ln1_g
            pl.BlockSpec((1, 1, D), lambda b, l: (l, 0, 0)),        # ln1_b
            pl.BlockSpec((1, D, 3 * HD), lambda b, l: (l, 0, 0)),   # wqkv
            pl.BlockSpec((1, HD, D), lambda b, l: (l, 0, 0)),       # wo
            pl.BlockSpec((1, 1, D), lambda b, l: (l, 0, 0)),        # ln2_g
            pl.BlockSpec((1, 1, D), lambda b, l: (l, 0, 0)),        # ln2_b
            pl.BlockSpec((1, D, F), lambda b, l: (l, 0, 0)),        # w1
            pl.BlockSpec((1, 1, F), lambda b, l: (l, 0, 0)),        # b1
            pl.BlockSpec((1, F, D), lambda b, l: (l, 0, 0)),        # w2
            pl.BlockSpec((1, 1, D), lambda b, l: (l, 0, 0)),        # b2
            pl.BlockSpec((D, Vp), lambda b, l: (0, 0)),             # w_logits
        ],
        out_specs=pl.BlockSpec((1, S, Vp), lambda b, l: (b, 0, 0)),
        scratch_shapes=[
            pltpu.VMEM((S, D), jnp.float32),    # resident activation
            pltpu.VMEM((S, HD), jnp.float32),   # per-head attention outputs
        ],
    )

    logits_padded = pl.pallas_call(
        kernel,
        out_shape=jax.ShapeDtypeStruct((B, S, Vp), jnp.float32),
        grid_spec=grid_spec,
        compiler_params=pltpu.CompilerParams(
            dimension_semantics=("parallel", "arbitrary")),
    )(x, pe,
      st["ln1_g"], st["ln1_b"], st["wqkv"], st["wo"],
      st["ln2_g"], st["ln2_b"], st["w1"], st["b1"], st["w2"], st["b2"],
      params["w_logits"])

    return logits_padded[:, :, :num_tokens]


# --------------------------------- main --------------------------------------

if __name__ == "__main__":
    num_tokens = 64
    max_seq_len = 16
    dim = 32
    n_layers = 2
    n_head = 2
    d_head = 16
    ffn_mul = 2
    batch, seq = 2, 8

    root = jax.random.PRNGKey(0)
    k_par, k_tok = jax.random.split(root)
    params = init_params(k_par, num_tokens=num_tokens, max_seq_len=max_seq_len,
                         dim=dim, n_layers=n_layers, n_head=n_head,
                         d_head=d_head, ffn_mul=ffn_mul)
    tokens = jax.random.randint(k_tok, (batch, seq), 0, num_tokens,
                                dtype=jnp.int32)

    fwd = jax.jit(functools.partial(forward, n_head=n_head, d_head=d_head,
                                    num_tokens=num_tokens))
    logits = jax.block_until_ready(fwd(tokens, params))
    assert logits.shape == (batch, seq, num_tokens), logits.shape
    assert logits.dtype == jnp.float32
    print("KERNEL_OK")
</pallas_src>

<mosaic_0001>
module attributes {stable_mosaic.version = 11 : i64} {
  func.func @_decoder_kernel(%arg0: i32, %arg1: i32, %arg2: memref<1x8x32xf32, #tpu.memory_space<vmem>>, %arg3: memref<8x32xf32, #tpu.memory_space<vmem>>, %arg4: memref<1x1x32xf32, #tpu.memory_space<vmem>>, %arg5: memref<1x1x32xf32, #tpu.memory_space<vmem>>, %arg6: memref<1x32x96xbf16, #tpu.memory_space<vmem>>, %arg7: memref<1x32x32xbf16, #tpu.memory_space<vmem>>, %arg8: memref<1x1x32xf32, #tpu.memory_space<vmem>>, %arg9: memref<1x1x32xf32, #tpu.memory_space<vmem>>, %arg10: memref<1x32x64xbf16, #tpu.memory_space<vmem>>, %arg11: memref<1x1x64xf32, #tpu.memory_space<vmem>>, %arg12: memref<1x64x32xbf16, #tpu.memory_space<vmem>>, %arg13: memref<1x1x32xf32, #tpu.memory_space<vmem>>, %arg14: memref<32x128xbf16, #tpu.memory_space<vmem>>, %arg15: memref<1x8x128xf32, #tpu.memory_space<vmem>>, %arg16: memref<8x32xf32, #tpu.memory_space<vmem>>, %arg17: memref<8x32xf32, #tpu.memory_space<vmem>>) attributes {dimension_semantics = [#tpu.dimension_semantics<parallel>, #tpu.dimension_semantics<arbitrary>], iteration_bounds = array<i64: 2, 2>, scalar_prefetch = 0 : i64, scratch_operands = 2 : i64, tpu.core_type = #tpu.core_type<tc>, window_params = [{transform_indices = @transform_0, window_bounds = array<i64: 1, 8, 32>}, {pipeline_mode = #tpu.pipeline_mode<synchronous>, transform_indices = @transform_1, window_bounds = array<i64: 8, 32>}, {transform_indices = @transform_2, window_bounds = array<i64: 1, 1, 32>}, {transform_indices = @transform_3, window_bounds = array<i64: 1, 1, 32>}, {transform_indices = @transform_4, window_bounds = array<i64: 1, 32, 96>}, {transform_indices = @transform_5, window_bounds = array<i64: 1, 32, 32>}, {transform_indices = @transform_6, window_bounds = array<i64: 1, 1, 32>}, {transform_indices = @transform_7, window_bounds = array<i64: 1, 1, 32>}, {transform_indices = @transform_8, window_bounds = array<i64: 1, 32, 64>}, {transform_indices = @transform_9, window_bounds = array<i64: 1, 1, 64>}, {transform_indices = @transform_10, window_bounds = array<i64: 1, 64, 32>}, {transform_indices = @transform_11, window_bounds = array<i64: 1, 1, 32>}, {pipeline_mode = #tpu.pipeline_mode<synchronous>, transform_indices = @transform_12, window_bounds = array<i64: 32, 128>}, {transform_indices = @transform_13, window_bounds = array<i64: 1, 8, 128>}]} {
    %c0_i32 = arith.constant 0 : i32
    %0 = arith.cmpi eq, %arg1, %c0_i32 : i32
    %1 = arith.extui %0 : i1 to i32
    %c0_i32_0 = arith.constant 0 : i32
    %2 = arith.cmpi ne, %1, %c0_i32_0 : i32
    scf.if %2 {
      %c0_67 = arith.constant 0 : index
      %c0_68 = arith.constant 0 : index
      %c0_69 = arith.constant 0 : index
      %147 = vector.load %arg2[%c0_67, %c0_68, %c0_69] : memref<1x8x32xf32, #tpu.memory_space<vmem>>, vector<1x8x32xf32>
      %148 = vector.shape_cast %147 : vector<1x8x32xf32> to vector<8x32xf32>
      %c0_70 = arith.constant 0 : index
      %c0_71 = arith.constant 0 : index
      %149 = vector.load %arg3[%c0_70, %c0_71] : memref<8x32xf32, #tpu.memory_space<vmem>>, vector<8x32xf32>
      %150 = arith.addf %148, %149 : vector<8x32xf32>
      %c0_72 = arith.constant 0 : index
      %c0_73 = arith.constant 0 : index
      %151 = vector.load %arg16[%c0_72, %c0_73] : memref<8x32xf32, #tpu.memory_space<vmem>>, vector<8x32xf32>
      tpu.vector_store %arg16[%c0_72, %c0_73], %150 {strides = array<i32>} : memref<8x32xf32, #tpu.memory_space<vmem>>, vector<8x32xf32>,
    } else {
    }
    %3 = tpu.iota {dimensions = array<i32: 0>} : vector<8x8xi32>
    %4 = tpu.iota {dimensions = array<i32: 1>} : vector<8x8xi32>
    %5 = arith.cmpi sle, %4, %3 : vector<8x8xi32>
    %c0 = arith.constant 0 : index
    %c0_1 = arith.constant 0 : index
    %6 = vector.load %arg16[%c0, %c0_1] : memref<8x32xf32, #tpu.memory_space<vmem>>, vector<8x32xf32>
    %c0_2 = arith.constant 0 : index
    %c0_3 = arith.constant 0 : index
    %c0_4 = arith.constant 0 : index
    %7 = vector.load %arg4[%c0_2, %c0_3, %c0_4] : memref<1x1x32xf32, #tpu.memory_space<vmem>>, vector<1x1x32xf32>
    %8 = vector.shape_cast %7 : vector<1x1x32xf32> to vector<1x32xf32>
    %c0_5 = arith.constant 0 : index
    %c0_6 = arith.constant 0 : index
    %c0_7 = arith.constant 0 : index
    %9 = vector.load %arg5[%c0_5, %c0_6, %c0_7] : memref<1x1x32xf32, #tpu.memory_space<vmem>>, vector<1x1x32xf32>
    %10 = vector.shape_cast %9 : vector<1x1x32xf32> to vector<1x32xf32>
    %cst = arith.constant dense<0.000000e+00> : vector<8xf32>
    %11 = vector.multi_reduction <add>, %6, %cst [1] : vector<8x32xf32> to vector<8xf32>
    %12 = vector.shape_cast %11 : vector<8xf32> to vector<8x1xf32>
    %cst_8 = arith.constant 3.200000e+01 : f32
    %13 = vector.broadcast %cst_8 : f32 to vector<8x1xf32>
    %14 = arith.divf %12, %13 : vector<8x1xf32>
    %15 = vector.broadcast %14 : vector<8x1xf32> to vector<8x32xf32>
    %16 = arith.subf %6, %15 : vector<8x32xf32>
    %17 = arith.mulf %16, %16 : vector<8x32xf32>
    %cst_9 = arith.constant dense<0.000000e+00> : vector<8xf32>
    %18 = vector.multi_reduction <add>, %17, %cst_9 [1] : vector<8x32xf32> to vector<8xf32>
    %19 = vector.shape_cast %18 : vector<8xf32> to vector<8x1xf32>
    %cst_10 = arith.constant 3.200000e+01 : f32
    %20 = vector.broadcast %cst_10 : f32 to vector<8x1xf32>
    %21 = arith.divf %19, %20 : vector<8x1xf32>
    %22 = vector.broadcast %14 : vector<8x1xf32> to vector<8x32xf32>
    %23 = arith.subf %6, %22 : vector<8x32xf32>
    %cst_11 = arith.constant 9.99999974E-6 : f32
    %24 = vector.broadcast %cst_11 : f32 to vector<8x1xf32>
    %25 = arith.addf %21, %24 : vector<8x1xf32>
    %26 = math.rsqrt %25 : vector<8x1xf32>
    %27 = vector.broadcast %26 : vector<8x1xf32> to vector<8x32xf32>
    %28 = arith.mulf %23, %27 : vector<8x32xf32>
    %29 = vector.broadcast %8 : vector<1x32xf32> to vector<8x32xf32>
    %30 = arith.mulf %28, %29 : vector<8x32xf32>
    %31 = vector.broadcast %10 : vector<1x32xf32> to vector<8x32xf32>
    %32 = arith.addf %30, %31 : vector<8x32xf32>
    %33 = arith.truncf %32 : vector<8x32xf32> to vector<8x32xbf16>
    %c0_12 = arith.constant 0 : index
    %c0_13 = arith.constant 0 : index
    %c0_14 = arith.constant 0 : index
    %34 = vector.load %arg6[%c0_12, %c0_13, %c0_14] : memref<1x32x96xbf16, #tpu.memory_space<vmem>>, vector<1x32x96xbf16>
    %35 = vector.shape_cast %34 : vector<1x32x96xbf16> to vector<32x96xbf16>
    %cst_15 = arith.constant dense<0.000000e+00> : vector<8x96xf32>
    %36 = tpu.matmul %33, %35, %cst_15 {dimension_numbers = #tpu.dot_dimension_numbers<[1], [0], [0], [1], [0, 0, 1, 1], [], []>} : vector<8x32xbf16>, vector<32x96xbf16>, vector<8x96xf32> -> vector<8x96xf32>
    %37 = vector.extract_strided_slice %36 {offsets = [0, 0], sizes = [8, 16], strides = [1, 1]} : vector<8x96xf32> to vector<8x16xf32>
    %38 = vector.extract_strided_slice %36 {offsets = [0, 32], sizes = [8, 16], strides = [1, 1]} : vector<8x96xf32> to vector<8x16xf32>
    %39 = vector.extract_strided_slice %36 {offsets = [0, 64], sizes = [8, 16], strides = [1, 1]} : vector<8x96xf32> to vector<8x16xf32>
    %40 = arith.truncf %37 : vector<8x16xf32> to vector<8x16xbf16>
    %41 = arith.truncf %38 : vector<8x16xf32> to vector<8x16xbf16>
    %cst_16 = arith.constant dense<0.000000e+00> : vector<8x8xf32>
    %42 = tpu.matmul %40, %41, %cst_16 {dimension_numbers = #tpu.dot_dimension_numbers<[1], [1], [0], [0], [0, 0, 1, 0], [], []>} : vector<8x16xbf16>, vector<8x16xbf16>, vector<8x8xf32> -> vector<8x8xf32>
    %cst_17 = arith.constant -1.000000e+30 : f32
    %43 = vector.broadcast %cst_17 : f32 to vector<8x8xf32>
    %44 = arith.select %5, %42, %43 : vector<8x8xi1>, vector<8x8xf32>
    %cst_18 = arith.constant dense<0xFF800000> : vector<8xf32>
    %45 = vector.multi_reduction <maximumf>, %44, %cst_18 [1] : vector<8x8xf32> to vector<8xf32>
    %46 = vector.shape_cast %45 : vector<8xf32> to vector<8x1xf32>
    %47 = vector.broadcast %46 : vector<8x1xf32> to vector<8x8xf32>
    %48 = arith.subf %44, %47 : vector<8x8xf32>
    %49 = math.exp %48 : vector<8x8xf32>
    %cst_19 = arith.constant dense<0.000000e+00> : vector<8xf32>
    %50 = vector.multi_reduction <add>, %49, %cst_19 [1] : vector<8x8xf32> to vector<8xf32>
    %51 = vector.shape_cast %50 : vector<8xf32> to vector<8x1xf32>
    %52 = tpu.reciprocal %51 {approx = true} : vector<8x1xf32> -> vector<8x1xf32>
    %53 = vector.broadcast %52 : vector<8x1xf32> to vector<8x8xf32>
    %54 = arith.mulf %49, %53 : vector<8x8xf32>
    %55 = arith.truncf %54 : vector<8x8xf32> to vector<8x8xbf16>
    %56 = arith.truncf %39 : vector<8x16xf32> to vector<8x16xbf16>
    %cst_20 = arith.constant dense<0.000000e+00> : vector<8x16xf32>
    %57 = tpu.matmul %55, %56, %cst_20 {dimension_numbers = #tpu.dot_dimension_numbers<[1], [0], [0], [1], [0, 0, 1, 1], [], []>} : vector<8x8xbf16>, vector<8x16xbf16>, vector<8x16xf32> -> vector<8x16xf32>
    %c0_21 = arith.constant 0 : index
    %c0_22 = arith.constant 0 : index
    %58 = vector.load %arg17[%c0_21, %c0_22] : memref<8x32xf32, #tpu.memory_space<vmem>>, vector<8x16xf32>
    tpu.vector_store %arg17[%c0_21, %c0_22], %57 {strides = array<i32>} : memref<8x32xf32, #tpu.memory_space<vmem>>, vector<8x16xf32>,
    %59 = vector.extract_strided_slice %36 {offsets = [0, 16], sizes = [8, 16], strides = [1, 1]} : vector<8x96xf32> to vector<8x16xf32>
    %60 = vector.extract_strided_slice %36 {offsets = [0, 48], sizes = [8, 16], strides = [1, 1]} : vector<8x96xf32> to vector<8x16xf32>
    %61 = vector.extract_strided_slice %36 {offsets = [0, 80], sizes = [8, 16], strides = [1, 1]} : vector<8x96xf32> to vector<8x16xf32>
    %62 = arith.truncf %59 : vector<8x16xf32> to vector<8x16xbf16>
    %63 = arith.truncf %60 : vector<8x16xf32> to vector<8x16xbf16>
    %cst_23 = arith.constant dense<0.000000e+00> : vector<8x8xf32>
    %64 = tpu.matmul %62, %63, %cst_23 {dimension_numbers = #tpu.dot_dimension_numbers<[1], [1], [0], [0], [0, 0, 1, 0], [], []>} : vector<8x16xbf16>, vector<8x16xbf16>, vector<8x8xf32> -> vector<8x8xf32>
    %cst_24 = arith.constant -1.000000e+30 : f32
    %65 = vector.broadcast %cst_24 : f32 to vector<8x8xf32>
    %66 = arith.select %5, %64, %65 : vector<8x8xi1>, vector<8x8xf32>
    %cst_25 = arith.constant dense<0xFF800000> : vector<8xf32>
    %67 = vector.multi_reduction <maximumf>, %66, %cst_25 [1] : vector<8x8xf32> to vector<8xf32>
    %68 = vector.shape_cast %67 : vector<8xf32> to vector<8x1xf32>
    %69 = vector.broadcast %68 : vector<8x1xf32> to vector<8x8xf32>
    %70 = arith.subf %66, %69 : vector<8x8xf32>
    %71 = math.exp %70 : vector<8x8xf32>
    %cst_26 = arith.constant dense<0.000000e+00> : vector<8xf32>
    %72 = vector.multi_reduction <add>, %71, %cst_26 [1] : vector<8x8xf32> to vector<8xf32>
    %73 = vector.shape_cast %72 : vector<8xf32> to vector<8x1xf32>
    %74 = tpu.reciprocal %73 {approx = true} : vector<8x1xf32> -> vector<8x1xf32>
    %75 = vector.broadcast %74 : vector<8x1xf32> to vector<8x8xf32>
    %76 = arith.mulf %71, %75 : vector<8x8xf32>
    %77 = arith.truncf %76 : vector<8x8xf32> to vector<8x8xbf16>
    %78 = arith.truncf %61 : vector<8x16xf32> to vector<8x16xbf16>
    %cst_27 = arith.constant dense<0.000000e+00> : vector<8x16xf32>
    %79 = tpu.matmul %77, %78, %cst_27 {dimension_numbers = #tpu.dot_dimension_numbers<[1], [0], [0], [1], [0, 0, 1, 1], [], []>} : vector<8x8xbf16>, vector<8x16xbf16>, vector<8x16xf32> -> vector<8x16xf32>
    %c0_28 = arith.constant 0 : index
    %c16 = arith.constant 16 : index
    %80 = vector.load %arg17[%c0_28, %c16] : memref<8x32xf32, #tpu.memory_space<vmem>>, vector<8x16xf32>
    tpu.vector_store %arg17[%c0_28, %c16], %79 {strides = array<i32>} : memref<8x32xf32, #tpu.memory_space<vmem>>, vector<8x16xf32>,
    %c0_29 = arith.constant 0 : index
    %c0_30 = arith.constant 0 : index
    %81 = vector.load %arg17[%c0_29, %c0_30] : memref<8x32xf32, #tpu.memory_space<vmem>>, vector<8x32xf32>
    %82 = arith.truncf %81 : vector<8x32xf32> to vector<8x32xbf16>
    %c0_31 = arith.constant 0 : index
    %c0_32 = arith.constant 0 : index
    %c0_33 = arith.constant 0 : index
    %83 = vector.load %arg7[%c0_31, %c0_32, %c0_33] : memref<1x32x32xbf16, #tpu.memory_space<vmem>>, vector<1x32x32xbf16>
    %84 = vector.shape_cast %83 : vector<1x32x32xbf16> to vector<32x32xbf16>
    %cst_34 = arith.constant dense<0.000000e+00> : vector<8x32xf32>
    %85 = tpu.matmul %82, %84, %cst_34 {dimension_numbers = #tpu.dot_dimension_numbers<[1], [0], [0], [1], [0, 0, 1, 1], [], []>} : vector<8x32xbf16>, vector<32x32xbf16>, vector<8x32xf32> -> vector<8x32xf32>
    %86 = arith.addf %6, %85 : vector<8x32xf32>
    %c0_35 = arith.constant 0 : index
    %c0_36 = arith.constant 0 : index
    %c0_37 = arith.constant 0 : index
    %87 = vector.load %arg8[%c0_35, %c0_36, %c0_37] : memref<1x1x32xf32, #tpu.memory_space<vmem>>, vector<1x1x32xf32>
    %88 = vector.shape_cast %87 : vector<1x1x32xf32> to vector<1x32xf32>
    %c0_38 = arith.constant 0 : index
    %c0_39 = arith.constant 0 : index
    %c0_40 = arith.constant 0 : index
    %89 = vector.load %arg9[%c0_38, %c0_39, %c0_40] : memref<1x1x32xf32, #tpu.memory_space<vmem>>, vector<1x1x32xf32>
    %90 = vector.shape_cast %89 : vector<1x1x32xf32> to vector<1x32xf32>
    %cst_41 = arith.constant dense<0.000000e+00> : vector<8xf32>
    %91 = vector.multi_reduction <add>, %86, %cst_41 [1] : vector<8x32xf32> to vector<8xf32>
    %92 = vector.shape_cast %91 : vector<8xf32> to vector<8x1xf32>
    %cst_42 = arith.constant 3.200000e+01 : f32
    %93 = vector.broadcast %cst_42 : f32 to vector<8x1xf32>
    %94 = arith.divf %92, %93 : vector<8x1xf32>
    %95 = vector.broadcast %94 : vector<8x1xf32> to vector<8x32xf32>
    %96 = arith.subf %86, %95 : vector<8x32xf32>
    %97 = arith.mulf %96, %96 : vector<8x32xf32>
    %cst_43 = arith.constant dense<0.000000e+00> : vector<8xf32>
    %98 = vector.multi_reduction <add>, %97, %cst_43 [1] : vector<8x32xf32> to vector<8xf32>
    %99 = vector.shape_cast %98 : vector<8xf32> to vector<8x1xf32>
    %cst_44 = arith.constant 3.200000e+01 : f32
    %100 = vector.broadcast %cst_44 : f32 to vector<8x1xf32>
    %101 = arith.divf %99, %100 : vector<8x1xf32>
    %102 = vector.broadcast %94 : vector<8x1xf32> to vector<8x32xf32>
    %103 = arith.subf %86, %102 : vector<8x32xf32>
    %cst_45 = arith.constant 9.99999974E-6 : f32
    %104 = vector.broadcast %cst_45 : f32 to vector<8x1xf32>
    %105 = arith.addf %101, %104 : vector<8x1xf32>
    %106 = math.rsqrt %105 : vector<8x1xf32>
    %107 = vector.broadcast %106 : vector<8x1xf32> to vector<8x32xf32>
    %108 = arith.mulf %103, %107 : vector<8x32xf32>
    %109 = vector.broadcast %88 : vector<1x32xf32> to vector<8x32xf32>
    %110 = arith.mulf %108, %109 : vector<8x32xf32>
    %111 = vector.broadcast %90 : vector<1x32xf32> to vector<8x32xf32>
    %112 = arith.addf %110, %111 : vector<8x32xf32>
    %113 = arith.truncf %112 : vector<8x32xf32> to vector<8x32xbf16>
    %c0_46 = arith.constant 0 : index
    %c0_47 = arith.constant 0 : index
    %c0_48 = arith.constant 0 : index
    %114 = vector.load %arg10[%c0_46, %c0_47, %c0_48] : memref<1x32x64xbf16, #tpu.memory_space<vmem>>, vector<1x32x64xbf16>
    %115 = vector.shape_cast %114 : vector<1x32x64xbf16> to vector<32x64xbf16>
    %cst_49 = arith.constant dense<0.000000e+00> : vector<8x64xf32>
    %116 = tpu.matmul %113, %115, %cst_49 {dimension_numbers = #tpu.dot_dimension_numbers<[1], [0], [0], [1], [0, 0, 1, 1], [], []>} : vector<8x32xbf16>, vector<32x64xbf16>, vector<8x64xf32> -> vector<8x64xf32>
    %c0_50 = arith.constant 0 : index
    %c0_51 = arith.constant 0 : index
    %c0_52 = arith.constant 0 : index
    %117 = vector.load %arg11[%c0_50, %c0_51, %c0_52] : memref<1x1x64xf32, #tpu.memory_space<vmem>>, vector<1x1x64xf32>
    %118 = vector.shape_cast %117 : vector<1x1x64xf32> to vector<1x64xf32>
    %119 = vector.broadcast %118 : vector<1x64xf32> to vector<8x64xf32>
    %120 = arith.addf %116, %119 : vector<8x64xf32>
    %121 = arith.mulf %120, %120 : vector<8x64xf32>
    %122 = arith.mulf %120, %121 : vector<8x64xf32>
    %cst_53 = arith.constant 4.471500e-02 : f32
    %123 = vector.broadcast %cst_53 : f32 to vector<8x64xf32>
    %124 = arith.mulf %123, %122 : vector<8x64xf32>
    %125 = arith.addf %120, %124 : vector<8x64xf32>
    %cst_54 = arith.constant 0.797884583 : f32
    %126 = vector.broadcast %cst_54 : f32 to vector<8x64xf32>
    %127 = arith.mulf %126, %125 : vector<8x64xf32>
    %128 = math.tanh %127 : vector<8x64xf32>
    %cst_55 = arith.constant 1.000000e+00 : f32
    %129 = vector.broadcast %cst_55 : f32 to vector<8x64xf32>
    %130 = arith.addf %129, %128 : vector<8x64xf32>
    %cst_56 = arith.constant 5.000000e-01 : f32
    %131 = vector.broadcast %cst_56 : f32 to vector<8x64xf32>
    %132 = arith.mulf %131, %130 : vector<8x64xf32>
    %133 = arith.mulf %120, %132 : vector<8x64xf32>
    %134 = arith.truncf %133 : vector<8x64xf32> to vector<8x64xbf16>
    %c0_57 = arith.constant 0 : index
    %c0_58 = arith.constant 0 : index
    %c0_59 = arith.constant 0 : index
    %135 = vector.load %arg12[%c0_57, %c0_58, %c0_59] : memref<1x64x32xbf16, #tpu.memory_space<vmem>>, vector<1x64x32xbf16>
    %136 = vector.shape_cast %135 : vector<1x64x32xbf16> to vector<64x32xbf16>
    %cst_60 = arith.constant dense<0.000000e+00> : vector<8x32xf32>
    %137 = tpu.matmul %134, %136, %cst_60 {dimension_numbers = #tpu.dot_dimension_numbers<[1], [0], [0], [1], [0, 0, 1, 1], [], []>} : vector<8x64xbf16>, vector<64x32xbf16>, vector<8x32xf32> -> vector<8x32xf32>
    %c0_61 = arith.constant 0 : index
    %c0_62 = arith.constant 0 : index
    %c0_63 = arith.constant 0 : index
    %138 = vector.load %arg13[%c0_61, %c0_62, %c0_63] : memref<1x1x32xf32, #tpu.memory_space<vmem>>, vector<1x1x32xf32>
    %139 = vector.shape_cast %138 : vector<1x1x32xf32> to vector<1x32xf32>
    %140 = vector.broadcast %139 : vector<1x32xf32> to vector<8x32xf32>
    %141 = arith.addf %137, %140 : vector<8x32xf32>
    %142 = arith.addf %86, %141 : vector<8x32xf32>
    %c0_64 = arith.constant 0 : index
    %c0_65 = arith.constant 0 : index
    %143 = vector.load %arg16[%c0_64, %c0_65] : memref<8x32xf32, #tpu.memory_space<vmem>>, vector<8x32xf32>
    tpu.vector_store %arg16[%c0_64, %c0_65], %142 {strides = array<i32>} : memref<8x32xf32, #tpu.memory_space<vmem>>, vector<8x32xf32>,
    %c1_i32 = arith.constant 1 : i32
    %144 = arith.cmpi eq, %arg1, %c1_i32 : i32
    %145 = arith.extui %144 : i1 to i32
    %c0_i32_66 = arith.constant 0 : i32
    %146 = arith.cmpi ne, %145, %c0_i32_66 : i32
    scf.if %146 {
      %c0_67 = arith.constant 0 : index
      %c0_68 = arith.constant 0 : index
      %147 = vector.load %arg16[%c0_67, %c0_68] : memref<8x32xf32, #tpu.memory_space<vmem>>, vector<8x32xf32>
      %148 = arith.truncf %147 : vector<8x32xf32> to vector<8x32xbf16>
      %c0_69 = arith.constant 0 : index
      %c0_70 = arith.constant 0 : index
      %149 = vector.load %arg14[%c0_69, %c0_70] : memref<32x128xbf16, #tpu.memory_space<vmem>>, vector<32x128xbf16>
      %cst_71 = arith.constant dense<0.000000e+00> : vector<8x128xf32>
      %150 = tpu.matmul %148, %149, %cst_71 {dimension_numbers = #tpu.dot_dimension_numbers<[1], [0], [0], [1], [0, 0, 1, 1], [], []>} : vector<8x32xbf16>, vector<32x128xbf16>, vector<8x128xf32> -> vector<8x128xf32>
      %c0_72 = arith.constant 0 : index
      %c0_73 = arith.constant 0 : index
      %c0_74 = arith.constant 0 : index
      %151 = vector.load %arg15[%c0_72, %c0_73, %c0_74] : memref<1x8x128xf32, #tpu.memory_space<vmem>>, vector<1x8x128xf32>
      %152 = vector.shape_cast %151 : vector<1x8x128xf32> to vector<8x128xf32>
      %153 = vector.shape_cast %150 : vector<8x128xf32> to vector<1x8x128xf32>
      tpu.vector_store %arg15[%c0_72, %c0_73, %c0_74], %153 {strides = array<i32>} : memref<1x8x128xf32, #tpu.memory_space<vmem>>, vector<1x8x128xf32>,
    } else {
    }
    return
  }
  func.func @transform_0(%arg0: i32, %arg1: i32) -> (i32, i32, i32) {
    %c0_i32 = arith.constant 0 : i32
    %c0_i32_0 = arith.constant 0 : i32
    %c0_i32_1 = arith.constant 0 : i32
    return %arg0, %c0_i32, %c0_i32_0 : i32, i32, i32
  }
  func.func @transform_1(%arg0: i32, %arg1: i32) -> (i32, i32) {
    %c0_i32 = arith.constant 0 : i32
    %c0_i32_0 = arith.constant 0 : i32
    %c0_i32_1 = arith.constant 0 : i32
    return %c0_i32, %c0_i32_0 : i32, i32
  }
  func.func @transform_2(%arg0: i32, %arg1: i32) -> (i32, i32, i32) {
    %c0_i32 = arith.constant 0 : i32
    %c0_i32_0 = arith.constant 0 : i32
    %c0_i32_1 = arith.constant 0 : i32
    return %arg1, %c0_i32, %c0_i32_0 : i32, i32, i32
  }
  func.func @transform_3(%arg0: i32, %arg1: i32) -> (i32, i32, i32) {
    %c0_i32 = arith.constant 0 : i32
    %c0_i32_0 = arith.constant 0 : i32
    %c0_i32_1 = arith.constant 0 : i32
    return %arg1, %c0_i32, %c0_i32_0 : i32, i32, i32
  }
  func.func @transform_4(%arg0: i32, %arg1: i32) -> (i32, i32, i32) {
    %c0_i32 = arith.constant 0 : i32
    %c0_i32_0 = arith.constant 0 : i32
    %c0_i32_1 = arith.constant 0 : i32
    return %arg1, %c0_i32, %c0_i32_0 : i32, i32, i32
  }
  func.func @transform_5(%arg0: i32, %arg1: i32) -> (i32, i32, i32) {
    %c0_i32 = arith.constant 0 : i32
    %c0_i32_0 = arith.constant 0 : i32
    %c0_i32_1 = arith.constant 0 : i32
    return %arg1, %c0_i32, %c0_i32_0 : i32, i32, i32
  }
  func.func @transform_6(%arg0: i32, %arg1: i32) -> (i32, i32, i32) {
    %c0_i32 = arith.constant 0 : i32
    %c0_i32_0 = arith.constant 0 : i32
    %c0_i32_1 = arith.constant 0 : i32
    return %arg1, %c0_i32, %c0_i32_0 : i32, i32, i32
  }
  func.func @transform_7(%arg0: i32, %arg1: i32) -> (i32, i32, i32) {
    %c0_i32 = arith.constant 0 : i32
    %c0_i32_0 = arith.constant 0 : i32
    %c0_i32_1 = arith.constant 0 : i32
    return %arg1, %c0_i32, %c0_i32_0 : i32, i32, i32
  }
  func.func @transform_8(%arg0: i32, %arg1: i32) -> (i32, i32, i32) {
    %c0_i32 = arith.constant 0 : i32
    %c0_i32_0 = arith.constant 0 : i32
    %c0_i32_1 = arith.constant 0 : i32
    return %arg1, %c0_i32, %c0_i32_0 : i32, i32, i32
  }
  func.func @transform_9(%arg0: i32, %arg1: i32) -> (i32, i32, i32) {
    %c0_i32 = arith.constant 0 : i32
    %c0_i32_0 = arith.constant 0 : i32
    %c0_i32_1 = arith.constant 0 : i32
    return %arg1, %c0_i32, %c0_i32_0 : i32, i32, i32
  }
  func.func @transform_10(%arg0: i32, %arg1: i32) -> (i32, i32, i32) {
    %c0_i32 = arith.constant 0 : i32
    %c0_i32_0 = arith.constant 0 : i32
    %c0_i32_1 = arith.constant 0 : i32
    return %arg1, %c0_i32, %c0_i32_0 : i32, i32, i32
  }
  func.func @transform_11(%arg0: i32, %arg1: i32) -> (i32, i32, i32) {
    %c0_i32 = arith.constant 0 : i32
    %c0_i32_0 = arith.constant 0 : i32
    %c0_i32_1 = arith.constant 0 : i32
    return %arg1, %c0_i32, %c0_i32_0 : i32, i32, i32
  }
  func.func @transform_12(%arg0: i32, %arg1: i32) -> (i32, i32) {
    %c0_i32 = arith.constant 0 : i32
    %c0_i32_0 = arith.constant 0 : i32
    %c0_i32_1 = arith.constant 0 : i32
    return %c0_i32, %c0_i32_0 : i32, i32
  }
  func.func @transform_13(%arg0: i32, %arg1: i32) -> (i32, i32, i32) {
    %c0_i32 = arith.constant 0 : i32
    %c0_i32_0 = arith.constant 0 : i32
    %c0_i32_1 = arith.constant 0 : i32
    return %arg0, %c0_i32, %c0_i32_0 : i32, i32, i32
  }
}

</mosaic_0001>

<bundles_post_ra>
// kernel: forward.1
= control target key start
LH: loop header
LB: loop body
LE: loop exit
PB: predicated region body
PF: predicated region fallthrough
CT: control target
= control target key end

     0   :  { %s2183_s0 = inlined_call_operand.vmem [shape: f32[2,8,32], index: 0, kind: input, shape index: {}]   ;;  %s2184_s1 = inlined_call_operand.vmem [shape: f32[8,32], index: 1, kind: input, shape index: {}]   ;;  %s2185_s2 = inlined_call_operand.vmem [shape: f32[2,1,32], index: 2, kind: input, shape index: {}]   ;;  %s2186_s3 = inlined_call_operand.vmem [shape: f32[2,1,32], index: 3, kind: input, shape index: {}]   ;;  %s2187_s4 = inlined_call_operand.vmem [shape: bf16[2,32,96], index: 4, kind: input, shape index: {}]   ;;  %s2188_s5 = inlined_call_operand.vmem [shape: bf16[2,32,32], index: 5, kind: input, shape index: {}]   ;;  %s2189_s6 = inlined_call_operand.vmem [shape: f32[2,1,32], index: 6, kind: input, shape index: {}]   ;;  %s2190_s7 = inlined_call_operand.vmem [shape: f32[2,1,32], index: 7, kind: input, shape index: {}]   ;;  %s2191_s8 = inlined_call_operand.vmem [shape: bf16[2,32,64], index: 8, kind: input, shape index: {}]   ;;  %s2192_s9 = inlined_call_operand.vmem [shape: f32[2,1,64], index: 9, kind: input, shape index: {}]   ;;  %s2193_s10 = inlined_call_operand.vmem [shape: bf16[2,64,32], index: 10, kind: input, shape index: {}]   ;;  %s2194_s11 = inlined_call_operand.vmem [shape: f32[2,1,32], index: 11, kind: input, shape index: {}]   ;;  %s2195_s12 = inlined_call_operand.vmem [shape: bf16[32,128], index: 12, kind: input, shape index: {}]   ;;  %s2196_s13 = inlined_call_operand.hbm [shape: f32[2,8,128], index: 13, kind: output, shape index: {}]  }
   0x1   :  { %2212 = sst [smem:[#allocation19_spill]] %s2183_s0 }
   0x2   :  { %2213 = sst [smem:[#allocation20_spill]] %s2184_s1 }
   0x3   :  { %2214 = sst [smem:[#allocation21_spill]] %s2187_s4 }
   0x4   :  { %2215 = sst [smem:[#allocation22_spill]] %s2188_s5 }
   0x5   :  { %2216 = sst [smem:[#allocation23_spill]] %s2195_s12 }
   0x6   :  { %2217 = sst [smem:[#allocation24_spill]] %s2196_s13 }
   0x7   :  { %18 = vsyncpa [#allocation5], 0 }
   0x8   :  { %20 = vsyncpa [#allocation5 + $0x1], 0  ;;  %s1885_s25 = smov 0   ;;  %s1887_s26 = smov 0  }
   0x9   :  { %s1889_s27 = smov 0   ;;  %s1891_s28 = smov 0  }
   0xa   :  { %s1893_s29 = smov 0   ;;  %s1895_s30 = smov 0  }
   0xb   :  { %s1897_s14 = smov 0   ;;  %s1899_s15 = smov 0  }
   0xc LB: > { %2218 = sst [smem:[#allocation7_spill]] %s1774_s25  ;;  %s1456_s16 = sadd.s32 4294967295, %s1802_s15   ;;  %s1802_s15 = sphi %s1899_s15, %s26_s15   ;;  %s1798_s14 = sphi %s1897_s14, %s2255_s14   ;;  %s1794_s30 = sphi %s1895_s30, %s2254_s30   ;;  %s1790_s29 = sphi %s1893_s29, %s2253_s29   ;;  %s1786_s28 = sphi %s1891_s28, %s2252_s28   ;;  %s1782_s27 = sphi %s1889_s27, %s2251_s27   ;;  %s1778_s26 = sphi %s1887_s26, %s2250_s26   ;;  %s1774_s25 = sphi %s1885_s25, %s2249_s25  }
   0xd   : > { %2219 = sst [smem:[#allocation8_spill]] %s1778_s26  ;;  %s1457_s17 = sadd.s32 4294967294, %s1802_s15  }
   0xe   : > { %2220 = sst [smem:[#allocation9_spill]] %s1782_s27  ;;  %s35_s18 = sadd.s32 1, %s1794_s30 }
   0xf   : > { %2221 = sst [smem:[#allocation10_spill]] %s1790_s29  ;;  %p36_p0 = scmp.ge.s32.totalorder %s35_s18, 2 }
  0x10   : > { %2222 = sst [smem:[#allocation11_spill]] %s1794_s30  ;;  %s38_s19 = sadd.s32 1, %s1798_s14 }
  0x11   : > { %2223 = sst [smem:[#allocation12_spill]] %s1798_s14  ;;  %p383_p1 = scmp.ne.s32.totalorder %s1782_s27, %s1778_s26 }
  0x12   : > { %2224 = sst [smem:[#allocation13_spill]] %s1802_s15  ;;  %p384_p2 = scmp.eq.s32.totalorder %s1456_s16, 3 }
  0x13   : > { %s2257_s18 = smov (%p36_p0, %s35_s18), 0  ;;  %s2259_s19 = smov (!%p36_p0, %s38_s19), %s1798_s14 }
  0x14   : > { %2225 = sst [smem:[#allocation14_spill]] %s2257_s18  ;;  %p1934_p3 = por %p384_p2, %p383_p1 }
  0x15   : > { %p389_p4 = scmp.ne.s32.totalorder %s1778_s26, %s1774_s25  ;;  %p40_p5 = scmp.ge.s32.totalorder %s2259_s19, 2 }
  0x16   : > { %s2226_s20 = scalar_select %p1934_p3, 1, 0 }
  0x17   : > { %p390_p6 = scmp.eq.s32.totalorder %s1457_s17, 3  ;;  %p1460_p7 = scmp.ge.s32.totalorder %s1802_s15, 1 }
  0x18   : > { %2227 = sst [smem:[#allocation15_spill]] %s2226_s20  ;;  %p489_p8 = scmp.lt.s32.totalorder %s1802_s15, 5 }
  0x19   : > { %s2261_s19 = smov (%p40_p5, %s2259_s19), 0  ;;  %p1944_p9 = por %p390_p6, %p389_p4 }
  0x1a   : > { %2228 = sst [smem:[#allocation16_spill]] %s2261_s19  ;;  %p490_p10 = pnand %p1460_p7, %p489_p8 }
  0x1b   : > { %s2229_s21 = scalar_select %p1944_p9, 1, 0 }
  0x1c   : > { %s370_s22 = ssub.s32 %s1798_s14, %s2261_s19  ;;  %s373_s23 = sadd.s32 1, %s1782_s27 }
  0x1d   : > { %2230 = sst [smem:[#allocation17_spill]] %s2229_s21  ;;  %p371_p11 = scmp.eq.s32.totalorder %s370_s22, 0 }
  0x1e   : > { %493 = sbr.rel (%p490_p10) target bundleno = 2828 (0xb0c), region = 72  ;;  %s2200_s16 = sand.u32 (!%p490_p10), 1, %s1778_s26  }
  0x1f   : > { %s1952_s24 = scalar_select %p371_p11, %s1782_s27, %s373_s23  }
  0x20   : > { %p570_p12 = scmp.lt.s32.totalorder (!%p490_p10), %s1790_s29, 1  ;;  %s1958_s17 = sshll.u32 (!%p490_p10), %s2200_s16, 3 }
  0x21   : > { %2231 = sst [smem:[#allocation18_spill]] %s1952_s24  ;;  %p574_p13 = scmp.lt.s32.totalorder (!%p490_p10), %s1786_s28, 1 }
  0x22   : > { %s2232_s0 = sld [smem:[#allocation19_spill]] (!%p490_p10)  ;;  %s2233_s4 = sld [smem:[#allocation21_spill]] (!%p490_p10) }
  0x23   : > { %s2234_s5 = sld [smem:[#allocation22_spill]] (!%p490_p10)  ;;  %s569_s16 = scalar_lea.vmem (!%p490_p10), [#allocation4], %s1958_s17 }
  0x24   : > { %p1471_p0 = scmp.ne.s32.totalorder (!%p490_p10), %s1786_s28, 0 }
  0x25   : > { %s571_s18 = scalar_select %p570_p12, %s1790_s29, 1 }
  0x26   : > { %s1963_s19 = scalar_select %p574_p13, %s1786_s28, 1 }
  0x27   : > { %s1462_s22 = sshll.u32 %s571_s18, 3  ;;  %616 = sbr.rel (%p1471_p0) target bundleno = 55 (0x37), region = 76  ;;  %vm620_vm0 = vcmask (!%p1471_p0), 261120  }
  0x28   : > { %s573_s30 = scalar_lea.vmem %s2232_s0, %s1462_s22  ;;  %s1504_s13 = sshll.u32 %s1963_s19, 4 }
  0x29   : > { %s1980_s29 = scalar_lea.vmem %s2233_s4, %s1504_s13  ;;  %s1985_s1 = scalar_lea.vmem %s2234_s5, %s1504_s13  ;;  %v617_v0 = vld [vmem:[%s573_s30] sm:$0xff] (!%p1471_p0) }
  0x2a   : > { %s595_s25 = scalar_lea.vmem %s2190_s7, %s1963_s19  ;;  %s1998_s27 = scalar_lea.vmem %s2191_s8, %s1504_s13 }
  0x2b   : > { %s603_s0 = scalar_lea.vmem %s2192_s9, %s1963_s19  ;;  %s1507_s12 = sshll.u32 %s1963_s19, 5 }
  0x2c   : > { %s611_s5 = scalar_lea.vmem %s2194_s11, %s1963_s19  ;;  %s2012_s24 = scalar_lea.vmem %s2193_s10, %s1507_s12 }
  0x2d   : > { %s2235_s23 = sld [smem:[#allocation20_spill]] (!%p1471_p0) }
  0x33   : > { %v618_v1 = vld [vmem:[%s2235_s23] sm:$0xff] }
  0x34   : > { %v619_v2 = vadd.f32 %v618_v1, %v617_v0 }
  0x36   : > { %621 = vst.msk [vmem:[#allocation2] sm:$0xff] %vm620_vm0, %v619_v2 }
  0x37 PF: > { %vm630_vm1 = vcmask 261120   ;;  %v1682_v10 = vld [vmem:[%s1980_s29] sm:$0xff]   ;;  %v1804_v11 = vmov 0.0   ;;  %vm1805_vm2 = vmmov 0   ;;  %v1683_v12 = vld [vmem:[%s1980_s29 + $0x8] sm:$0xff]   ;;  %s2236_s21 = scalar_lea.vmem %s2185_s2, %s1963_s19  ;;  %s2237_s20 = scalar_lea.vmem %s2186_s3, %s1963_s19  ;;  %vm723_vm3 = vcmask 130048  }
  0x38   : > { %1533 = vmatprep.subr.bf16.mxu0 %v1804_v11  ;;  %1537 = vmatprep.mubr.msk.bf16.mxu0 %vm1805_vm2, %v1804_v11  ;;  %v1472_v17 = vld [vmem:[%s2236_s21] ss:$0 sm:$0xff]  ;;  %s1806_s12 = smov 112   ;;  %s1807_s18 = smov 96   ;;  %v622_v33 = vlaneseq  ;;  %vm771_vm5 = vcmask 64512   ;;  %vm789_vm6 = vcmask 1043456  }
  0x39   : > { %1534 = vmatpush3.bf16.msra.mxu0 %v1682_v10  ;;  %1541 = vmatprep.subr.bf16.mxu1 %v1804_v11  ;;  %v1473_v19 = vld [vmem:[%s2237_s20] ss:$0 sm:$0xff]  ;;  %s1808_s14 = smov 80   ;;  %s1809_s22 = smov 48   ;;  %vm949_vm7 = vcmask 261248   ;;  %vm1158_vm8 = vcmask 523264  }
  0x3a   : > { %1535 = vmatprep.subr.bf16.mxu0 %v1804_v11  ;;  %1543 = vmatprep.mubr.msk.bf16.mxu1 %vm1805_vm2, %v1804_v11  ;;  %v623_v34 = vshrl.u32 %v622_v33, 7  ;;  %v625_v35 = vand.u32 127, %v622_v33  ;;  %s1810_s13 = smov 64   ;;  %s1811_s15 = smov 16  }
  0x3b   : > { %s2238_s4 = scalar_lea.vmem %s2189_s6, %s1963_s19  ;;  %p1496_p1 = scmp.ne.s32.totalorder %s1786_s28, 1 }
  0x3c   : > { %vm626_vm4 = vcmp.le.s32.totalorder %v625_v35, %v623_v34  ;;  %s2239_s20 = sld [smem:[#allocation23_spill]] (!%p1496_p1)  ;;  %vm1813_vm9 = vmmov (!%p1496_p1), 0  }
  0x3d   : > { %v2019_v3 = vld [vmem:[#allocation2] sm:$0xff]  ;;  %1536 = vmatpush3.bf16.msra.mxu0 %v1683_v12 }
  0x3e   : > { %v631_v4 = vsel %vm630_vm1, %v2019_v3, 0.0  ;;  %1547 = vmatprep.subr.bf16.mxu0 %v1804_v11 }
  0x3f   : > { %632 = vadd.xlane.f32.xlu0 %v631_v4 }
  0xcc   : > { %v633_v5 = vpop.xlane.xlu0 %632 }
  0xcd   : > { %v635_v6 = vmul.f32 0.03125, %v633_v5 }
  0xcf   : > { %v636_v7 = vsub.f32 %v2019_v3, %v635_v6 }
  0xd1   : > { %v637_v8 = vmul.f32 %v636_v7, %v636_v7 }
  0xd3   : > { %v638_v9 = vsel %vm630_vm1, %v637_v8, 0.0  ;;  %v1685_v8 = vld [vmem:[%s1985_s1 + $0x8] sm:$0xff]  }
  0xd4   : > { %639 = vadd.xlane.f32.xlu0 %v638_v9 }
 0x161   : > { %v640_v13 = vpop.xlane.xlu0 %639 }
 0x162   : > { %v641_v14 = vmul.f32 0.03125, %v640_v13 }
 0x164   : > { %v642_v15 = vadd.f32 1e-05, %v641_v14 }
 0x166   : > { %1692 = vrsqrt.f32 %v642_v15 }
 0x170   : > { %v1693_v16 = vpop.eup %1692 }
 0x171   : > { %v644_v18 = vmul.f32 %v1693_v16, %v636_v7  ;;  %v1684_v7 = vld [vmem:[%s1985_s1] sm:$0xff]  }
 0x173   : > { %v651_v20 = vmul.f32 %v1472_v17, %v644_v18 }
 0x175   : > { %v658_v21 = vadd.f32 %v1473_v19, %v651_v20 }
 0x177   : > { %v659_v22 = vpack.c.bf16 %v658_v21, %v658_v21 }
 0x179   : > { %1538 = vmatmul.mubr.msk.bf16.vlgmr.msra.gmra.mrb[0].mxu0 %vm630_vm1, %v659_v22 }
 0x17a   : > { %1549 = vmatprep.mubr.msk.bf16.mxu0 %vm1805_vm2, %v1804_v11 }
 0x24c   : > { %v713_v23 = vpop.f32.mrb[0].mxu0 }
 0x24d   : > { %v719_v24 = vpack.c.bf16 %v713_v23, %v713_v23  ;;  %v1539_v25 = vpop.f32.mrb[1].mxu0 }
 0x24e   : > { %v716_v26 = vpop.f32.mrb[2].mxu0 }
 0x24f   : > { %834 = vrot.lane.b32.xlu0 %v719_v24, %s1806_s12  ;;  %721 = vrot.lane.b32.xlu1 %v719_v24, %s1807_s18  ;;  %v1540_v27 = vpop.f32.mrb[3].mxu0 }
 0x253   : > { %836 = vrot.lane.b32.xlu1 %v719_v24, %s1808_s14 }
 0x2c1   : > { %v722_v28 = vpop.permute.xlu1 %721  ;;  %v835_v32 = vpop.permute.xlu0 %834 }
 0x2c2   : > { %v728_v29 = vsel %vm723_vm3, %v722_v28, 0 }
 0x2c3   : > { %1542 = vmatpush3.bf16.xpose.msra.mxu1 %v728_v29 }
 0x2c4   : > { %1553 = vmatprep.subr.bf16.mxu1 %v1804_v11 }
 0x2c5   : > { %v837_v30 = vpop.permute.xlu1 %836 }
 0x2c6   : > { %v842_v31 = vsel %vm723_vm3, %v837_v30, 0 }
 0x2ca   : > { %1544 = vmatmul.mubr.msk.bf16.vlgmr.msra.gmra.mrb[0].mxu1 %vm723_vm3, %v719_v24 }
 0x2cb   : > { %1554 = vmatpush3.bf16.xpose.msra.mxu1 %v842_v31  ;;  %1555 = vmatprep.mubr.msk.bf16.mxu1 %vm1805_vm2, %v1804_v11 }
 0x2cc   : > { %1565 = vmatprep.subr.bf16.mxu1 %v1804_v11 }
 0x2d2   : > { %1556 = vmatmul.mubr.msk.bf16.vlgmr.msra.gmra.mrb[4].mxu1 %vm723_vm3, %v835_v32  ;;  %v1686_v32 = vld [vmem:[%s1998_s27] sm:$0xff]  }
 0x2d3   : > { %1569 = vmatprep.mubr.msk.bf16.mxu1 %vm1805_vm2, %v1804_v11  ;;  %1566 = vmatpush3.bf16.msra.mxu1 %v1684_v7  ;;  %v1812_v7 = vmov (!%p1496_p1), 0.0  }
 0x2d4   : > { %1567 = vmatprep.subr.bf16.mxu1 %v1804_v11 }
 0x2d7   : > { %1568 = vmatpush3.bf16.msra.mxu1 %v1685_v8  ;;  %v1707_v8 = vld [vmem:[%s2239_s20 + $0x8] sm:$0xff] (!%p1496_p1)  }
 0x2d8   : > { %1581 = vmatprep.subr.bf16.mxu1 %v1804_v11 }
 0x39d   : > { %v764_v36 = vpop.f32.mrb[0].mxu1 }
 0x39e   : > { %v770_v37 = vsel %vm626_vm4, %v764_v36, -1e+30  ;;  %v1545_v38 = vpop.f32.mrb[1].mxu1 }
 0x39f   : > { %v767_v39 = vpop.f32.mrb[2].mxu1  ;;  %v772_v40 = vsel %vm771_vm5, %v770_v37, -inf }
 0x3a0   : > { %v1546_v41 = vpop.f32.mrb[3].mxu1  ;;  %773 = vmax.xlane.f32.xlu1 %v772_v40  ;;  %v1485_v39 = vld [vmem:[%s595_s25] ss:$0 sm:$0xff] }
 0x3a5   : > { %v878_v42 = vpop.f32.mrb[4].mxu1 }
 0x3a6   : > { %v884_v43 = vsel %vm626_vm4, %v878_v42, -1e+30  ;;  %v1557_v44 = vpop.f32.mrb[5].mxu1 }
 0x3a7   : > { %v881_v45 = vpop.f32.mrb[6].mxu1  ;;  %v885_v46 = vsel %vm771_vm5, %v884_v43, -inf  ;;  %v1689_v44 = vld [vmem:[%s2012_s24 + $0x8] sm:$0xff]  }
 0x3a8   : > { %v1558_v47 = vpop.f32.mrb[7].mxu1  ;;  %886 = vmax.xlane.f32.xlu0 %v885_v46  ;;  %v1690_v45 = vld [vmem:[%s2012_s24 + $0x10] sm:$0xff]   ;;  %v1691_v46 = vld [vmem:[%s2012_s24 + $0x18] sm:$0xff]  }
 0x3a9   : > { %v1486_v47 = vld [vmem:[%s603_s0] ss:$0 sm:$0xff] }
 0x3be   : > { %897 = vrot.lane.b32.xlu0 %v719_v24, %s1809_s22 }
 0x42d   : > { %v774_v48 = vpop.xlane.xlu1 %773 }
 0x42e   : > { %v775_v49 = vsub.f32 %v770_v37, %v774_v48  ;;  %v1484_v37 = vld [vmem:[%s2238_s4] ss:$0 sm:$0xff] }
 0x430   : > { %v776_v50 = vmul.f32 1.442695, %v775_v49 }
 0x432   : > { %1694 = vpow2.f32 %v776_v50 }
 0x435   : > { %v887_v51 = vpop.xlane.xlu0 %886 }
 0x436   : > { %v888_v52 = vsub.f32 %v884_v43, %v887_v51  ;;  %v1688_v43 = vld [vmem:[%s2012_s24] sm:$0xff]  }
 0x438   : > { %v889_v53 = vmul.f32 1.442695, %v888_v52 }
 0x439   : > { %v898_v0 = vpop.permute.xlu0 %897 }
 0x43a   : > { %1696 = vpow2.f32 %v889_v53  ;;  %v903_v2 = vsel %vm789_vm6, %v898_v0, 0 }
 0x43c   : > { %v1695_v54 = vpop.eup %1694 }
 0x43d   : > { %v778_v55 = vsel %vm771_vm5, %v1695_v54, 0.0 }
 0x43e   : > { %779 = vadd.xlane.f32.xlu1 %v778_v55 }
 0x444   : > { %v1697_v56 = vpop.eup %1696 }
 0x445   : > { %v891_v57 = vsel %vm771_vm5, %v1697_v56, 0.0 }
 0x446   : > { %892 = vadd.xlane.f32.xlu1 %v891_v57 }
 0x457   : > { %784 = vrot.lane.b32.xlu1 %v719_v24, %s1810_s13 }
 0x4cb   : > { %v780_v58 = vpop.xlane.xlu1 %779 }
 0x4cc   : > { %1698 = vrcp.f32 %v780_v58 }
 0x4d3   : > { %v893_v59 = vpop.xlane.xlu1 %892 }
 0x4d4   : > { %1700 = vrcp.f32 %v893_v59 }
 0x4d6   : > { %v1699_v60 = vpop.eup %1698 }
 0x4d7   : > { %v782_v61 = vmul.f32 %v1699_v60, %v1695_v54  ;;  %v785_v62 = vpop.permute.xlu1 %784 }
 0x4d8   : > { %v791_v63 = vsel %vm789_vm6, %v785_v62, 0  ;;  %v1490_v62 = vld [vmem:[%s611_s5] ss:$0 sm:$0xff] }
 0x4d9   : > { %1548 = vmatpush3.bf16.msra.mxu0 %v791_v63  ;;  %v783_v1 = vpack.c.bf16 %v782_v61, %v782_v61 }
 0x4da   : > { %1559 = vmatprep.subr.bf16.mxu0 %v1804_v11 }
 0x4dc   : > { %1550 = vmatmul.mubr.msk.bf16.vlgmr.msra.gmra.mrb[4].mxu0 %vm771_vm5, %v783_v1 }
 0x4dd   : > { %1560 = vmatpush3.bf16.msra.mxu0 %v903_v2  ;;  %1561 = vmatprep.mubr.msk.bf16.mxu0 %vm1805_vm2, %v1804_v11 }
 0x4de   : > { %v1701_v4 = vpop.eup %1700  ;;  %1573 = vmatprep.subr.bf16.mxu0 %v1804_v11 }
 0x4df   : > { %v895_v5 = vmul.f32 %v1701_v4, %v1697_v56 }
 0x4e1   : > { %v896_v6 = vpack.c.bf16 %v895_v5, %v895_v5 }
 0x4e4   : > { %1562 = vmatmul.mubr.msk.bf16.vlgmr.msra.gmra.mrb[8].mxu0 %vm771_vm5, %v896_v6  ;;  %v1706_v6 = vld [vmem:[%s2239_s20] sm:$0xff] (!%p1496_p1)  }
 0x4e5   : > { %1577 = vmatprep.mubr.msk.bf16.mxu0 %vm1805_vm2, %v1804_v11  ;;  %1574 = vmatpush3.bf16.msra.mxu0 %v1686_v32 }
 0x4e6   : > { %1575 = vmatprep.subr.bf16.mxu0 %v1804_v11 }
 0x5af   : > { %v827_v9 = vpop.f32.mrb[4].mxu0 }
 0x5b0   : > { %833 = vst.msk [vmem:[#allocation3] sm:$0xff] %vm723_vm3, %v827_v9  ;;  %v1551_v10 = vpop.f32.mrb[5].mxu0 }
 0x5b1   : > { %v830_v12 = vpop.f32.mrb[6].mxu0 }
 0x5b2   : > { %v1552_v13 = vpop.f32.mrb[7].mxu0 }
 0x5b7   : > { %v939_v14 = vpop.f32.mrb[8].mxu0 }
 0x5b8   : > { %946 = vrot.lane.b32.xlu1 %v939_v14, %s1811_s15  ;;  %v1563_v15 = vpop.f32.mrb[9].mxu0 }
 0x5b9   : > { %v942_v16 = vpop.f32.mrb[10].mxu0 }
 0x5ba   : > { %v1564_v17 = vpop.f32.mrb[11].mxu0 }
 0x62a   : > { %v947_v18 = vpop.permute.xlu1 %946 }
 0x62b   : > { %950 = vst.msk [vmem:[#allocation3] sm:$0xff] %vm949_vm7, %v947_v18 }
 0x632   : > { %v951_v19 = vld [vmem:[#allocation3] sm:$0xff] }
 0x633   : > { %v952_v20 = vpack.c.bf16 %v951_v19, %v951_v19 }
 0x635   : > { %1570 = vmatmul.mubr.msk.bf16.vlgmr.msra.gmra.mrb[8].mxu1 %vm630_vm1, %v952_v20 }
 0x636   : > { %1589 = vmatprep.mubr.msk.bf16.mxu1 %vm1805_vm2, %v1804_v11  ;;  %1582 = vmatpush3.bf16.msra.mxu1 %v1688_v43 }
 0x637   : > { %1583 = vmatprep.subr.bf16.mxu1 %v1804_v11 }
 0x63a   : > { %1584 = vmatpush3.bf16.msra.mxu1 %v1689_v44 }
 0x63b   : > { %1585 = vmatprep.subr.bf16.mxu1 %v1804_v11 }
 0x63e   : > { %1586 = vmatpush3.bf16.msra.mxu1 %v1690_v45 }
 0x63f   : > { %1587 = vmatprep.subr.bf16.mxu1 %v1804_v11 }
 0x642   : > { %1588 = vmatpush3.bf16.msra.mxu1 %v1691_v46 }
 0x708   : > { %v1006_v21 = vpop.f32.mrb[8].mxu1 }
 0x709   : > { %v2079_v22 = vadd.f32 %v1006_v21, %v2019_v3  ;;  %v1571_v23 = vpop.f32.mrb[9].mxu1  ;;  %v1687_v3 = vld [vmem:[%s1998_s27 + $0x8] sm:$0xff]  }
 0x70a   : > { %v1009_v24 = vpop.f32.mrb[10].mxu1  ;;  %1576 = vmatpush3.bf16.msra.mxu0 %v1687_v3 }
 0x70b   : > { %v1572_v25 = vpop.f32.mrb[11].mxu1  ;;  %v1015_v26 = vsel %vm630_vm1, %v2079_v22, 0.0  ;;  %1593 = vmatprep.subr.bf16.mxu0 (!%p1496_p1), %v1812_v7 }
 0x70c   : > { %1016 = vadd.xlane.f32.xlu1 %v1015_v26 }
 0x799   : > { %v1017_v27 = vpop.xlane.xlu1 %1016 }
 0x79a   : > { %v1018_v28 = vmul.f32 0.03125, %v1017_v27 }
 0x79c   : > { %v1019_v29 = vsub.f32 %v2079_v22, %v1018_v28 }
 0x79e   : > { %v1020_v30 = vmul.f32 %v1019_v29, %v1019_v29 }
 0x7a0   : > { %v1021_v31 = vsel %vm630_vm1, %v1020_v30, 0.0 }
 0x7a1   : > { %1022 = vadd.xlane.f32.xlu0 %v1021_v31 }
 0x82e   : > { %v1023_v33 = vpop.xlane.xlu0 %1022 }
 0x82f   : > { %v1024_v34 = vmul.f32 0.03125, %v1023_v33 }
 0x831   : > { %v1025_v35 = vadd.f32 1e-05, %v1024_v34 }
 0x833   : > { %1702 = vrsqrt.f32 %v1025_v35 }
 0x83d   : > { %v1703_v36 = vpop.eup %1702 }
 0x83e   : > { %v1027_v38 = vmul.f32 %v1703_v36, %v1019_v29 }
 0x840   : > { %v1034_v40 = vmul.f32 %v1484_v37, %v1027_v38 }
 0x842   : > { %v1041_v41 = vadd.f32 %v1485_v39, %v1034_v40 }
 0x844   : > { %v1042_v42 = vpack.c.bf16 %v1041_v41, %v1041_v41 }
 0x846   : > { %1578 = vmatmul.mubr.msk.bf16.vlgmr.msra.gmra.mrb[12].mxu0 %vm630_vm1, %v1042_v42 }
 0x847   : > { %1594 = vmatpush3.bf16.msra.mxu0 (!%p1496_p1), %v1706_v6  ;;  %1597 = vmatprep.mubr.msk.bf16.mxu0 (!%p1496_p1), %vm1813_vm9, %v1812_v7 }
 0x848   : > { %1595 = vmatprep.subr.bf16.mxu0 (!%p1496_p1), %v1812_v7 }
 0x84b   : > { %1596 = vmatpush3.bf16.msra.mxu0 (!%p1496_p1), %v1707_v8 }
 0x919   : > { %v1103_v48 = vpop.f32.mrb[12].mxu0 }
 0x91a   : > { %v1104_v49 = vadd.f32 %v1486_v47, %v1103_v48  ;;  %v1579_v50 = vpop.f32.mrb[13].mxu0 }
 0x91b   : > { %v1106_v51 = vpop.f32.mrb[14].mxu0 }
 0x91c   : > { %v1109_v52 = vmul.f32 %v1104_v49, %v1104_v49  ;;  %v1580_v53 = vpop.f32.mrb[15].mxu0 }
 0x91e   : > { %v1110_v54 = vmul.f32 %v1109_v52, %v1104_v49 }
 0x920   : > { %v1111_v55 = vmul.f32 0.044715, %v1110_v54 }
 0x922   : > { %v1112_v56 = vadd.f32 %v1111_v55, %v1104_v49 }
 0x924   : > { %v1113_v57 = vmul.f32 0.7978846, %v1112_v56 }
 0x926   : > { %1704 = vtanh.f32 %v1113_v57 }
 0x930   : > { %v1705_v11 = vpop.eup %1704 }
 0x931   : > { %v1115_v58 = vadd.f32 1.0, %v1705_v11 }
 0x933   : > { %v1116_v59 = vmul.f32 0.5, %v1115_v58 }
 0x935   : > { %v1117_v60 = vmul.f32 %v1116_v59, %v1104_v49 }
 0x937   : > { %v1118_v61 = vpack.c.bf16 %v1117_v60, %v1117_v60 }
 0x939   : > { %1590 = vmatmul.mubr.msk.bf16.vlgmr.msra.gmra.mrb[12].mxu1 %vm1158_vm8, %v1118_v61 }
 0xa0b   : > { %1207 = sbr.rel (%p1496_p1) target bundleno = 2802 (0xaf2), region = 80 }
 0xa0c   : > { %v1196_v63 = vpop.f32.mrb[12].mxu1 }
 0xa0d   : > { %v1197_v0 = vadd.f32 %v1490_v62, %v1196_v63  ;;  %v1591_v1 = vpop.f32.mrb[13].mxu1 }
 0xa0e   : > { %v1199_v2 = vpop.f32.mrb[14].mxu1 }
 0xa0f   : > { %v1202_v4 = vadd.f32 %v1197_v0, %v2079_v22  ;;  %v1592_v5 = vpop.f32.mrb[15].mxu1 }
 0xa11   : > { %1203 = vst.msk [vmem:[#allocation2] sm:$0xff] %vm630_vm1, %v1202_v4 }
 0xa18   : > { %v1208_v9 = vld [vmem:[#allocation2] sm:$0xff] }
 0xa19   : > { %v1209_v10 = vpack.c.bf16 %v1208_v9, %v1208_v9 }
 0xa1b   : > { %1598 = vmatmul.mubr.msk.bf16.vlgmr.msra.gmra.mrb[0].mxu0 %vm630_vm1, %v1209_v10 }
 0xaee   : > { %v1263_v12 = vpop.f32.mrb[0].mxu0 }
 0xaef   : > { %1269 = vst [vmem:[%s569_s16] sm:$0xff] %v1263_v12  ;;  %v1599_v13 = vpop.f32.mrb[1].mxu0 }
 0xaf0   : > { %v1266_v14 = vpop.f32.mrb[2].mxu0 }
 0xaf1   : > { %v1600_v15 = vpop.f32.mrb[3].mxu0 }
 0xaf2 PF: > { %s2240_s28 = sld [smem:[#allocation10_spill]]  ;;  %s2243_s15 = sld [smem:[#allocation24_spill]] }
 0xaf3   : > { %s2241_s12 = sld [smem:[#allocation8_spill]]  ;;  %s1284_s4 = sshll.u32 %s569_s16, 4  ;;  %s1285_s4 = int_to_ptr.vmem [resolvable:$true] %s1284_s4 }
 0xaf4   : > { %s1708_s27 = scalar_lea.vmem %s1285_s4, 128  ;;  %s1814_s25 = smov [#allocation4]  }
 0xaf5   : > { %p1709_p2 = scmp.ne.s32.totalorder %s1285_s4, %s1708_s27  ;;  %s1712_s0 = sshll.u32 %s1814_s25, 4  ;;  %s1713_s0 = int_to_ptr.vmem [resolvable:$false] %s1712_s0 }
 0xaf6   : > { %s1714_s24 = scalar_lea.vmem %s1713_s0, 256  ;;  %p1715_p6 = scmp.lt.s32.totalorder %s1285_s4, %s1713_s0 }
 0xaf7   : > { %p1710_p4 = pnand %p1709_p2, %p1934_p3  ;;  %p1716_p7 = scmp.lt.s32.totalorder %s1714_s24, %s1708_s27 }
 0xaf8   : > { %s1501_s14 = sshll.u32 %s2240_s28, 7  ;;  %s2244_s1 = smov %s2243_s15 }
 0xaf9   : > { %s2132_s23 = scalar_lea.hbm %s2243_s15, %s1501_s14  ;;  %s2245_s30 = sand.u32 1, %s2241_s12  }
 0xafa   : > { %s1271_s21 = scalar_lea.sflag [#allocation5], %s2245_s30  ;;  %p1711_p5 = pneg %p1710_p4 }
 0xafb   : > { %p1717_p8 = por %p1716_p7, %p1715_p6 }
 0xafd   : > { %p1718_p10 = pnand %p1717_p8, %p1711_p5 }
 0xaff   : > { %1721 = shalt.err (!%p1718_p10)
}
 0xb00   : > { %s1722_s17 = scalar_lea.hbm %s2132_s23, 128  ;;  %s1726_s26 = scalar_lea.hbm %s2244_s1, 256 }
 0xb01   : > { %p1723_p11 = scmp.ne.s32.totalorder %s2132_s23, %s1722_s17  ;;  %p1727_p0 = scmp.lt.u32.totalorder %s2132_s23, %s2244_s1 }
 0xb02   : > { %p1728_p1 = scmp.lt.u32.totalorder %s1726_s26, %s1722_s17  ;;  %p1730_p4 = scmp.lt.u32.totalorder %s1722_s17, %s2132_s23 }
 0xb03   : > { %p1724_p12 = pnand %p1723_p11, %p1934_p3 }
 0xb04   : > { %p1729_p2 = por %p1728_p1, %p1727_p0 }
 0xb05   : > { %p1725_p13 = pneg %p1724_p12 }
 0xb06   : > { %p1731_p5 = por %p1730_p4, %p1729_p2 }
 0xb08   : > { %p1732_p6 = pnand %p1731_p5, %p1725_p13 }
 0xb0a   : > { %1735 = shalt.err (!%p1732_p6)
}
 0xb0b   : > { %1601 = dma.vmem_to_hbm [thread:$0]  (%p1934_p3), %s1285_s4, 128, %s2132_s23, %s1271_s21  }
 0xb0c PF: > { %s2246_s28 = sld [smem:[#allocation13_spill]]  ;;  %s2247_s12 = sld [smem:[#allocation7_spill]] }
 0xb12   : > { %p1607_p7 = scmp.ge.s32.totalorder %s2246_s28, 2  ;;  %s1296_s22 = sand.u32 1, %s2247_s12  }
 0xb13   : > { %s1297_s13 = scalar_lea.sflag [#allocation5], %s1296_s22 }
 0xb14   : > { %p1604_p8 = pnand %p1607_p7, %p1944_p9 }
 0xb16   : > { %1769 = dma.done.wait (!%p1604_p8), %s1297_s13, 128  }
 0xb17   : > { %1771 = vsyncadd (!%p1604_p8), %s1297_s13, 4294967168  ;;  %s26_s15 = sadd.s32 1, %s2246_s28   ;;  %s2249_s25 = sld [smem:[#allocation8_spill]] }
 0xb18   : > { %p23_p10 = scmp.ge.s32.totalorder %s26_s15, 6   ;;  %s2250_s26 = sld [smem:[#allocation9_spill]] }
 0xb19   : > { %s2251_s27 = sld [smem:[#allocation18_spill]]  ;;  %s2252_s28 = sld [smem:[#allocation11_spill]] }
 0xb1a   : > { %s2253_s29 = sld [smem:[#allocation12_spill]]  ;;  %s2254_s30 = sld [smem:[#allocation14_spill]] }
 0xb1b   : > { %s2255_s14 = sld [smem:[#allocation16_spill]]  ;;  %25 = sbr.rel (!%p23_p10) target bundleno = 12 (0xc), region = 145 }
 0xb22   :  { %1302 = vsyncpa [#allocation5], 1 }
 0xb23   :  { %1304 = vsyncpa [#allocation5 + $0x1], 1 }

</bundles_post_ra>
